<compile_context>
chip_gen: v6e
topology: v6e:2x2x1
jax: 0.10.0
libtpu: 0.0.40
codegen_flags: <defaults>
</compile_context>

<pallas_src>
import functools
import math

import jax
import jax.numpy as jnp
import numpy as np
from jax.experimental import pallas as pl
from jax.experimental.pallas import tpu as pltpu

_NEG_INF = -1e30


# ------------------------------ Pallas kernel ------------------------------ #
def _attention_importance_kernel(x_ref, m_ref, imp_ref, *, n_valid, p_pad):
    """patch_importance = column-sums of softmax((X_aug M_aug) X_aug^T, axis=-1).

    x_ref  : (p_pad, D+1)  zero-padded flattened patches + trailing ones column
    m_ref  : (D+1, D+1)    folded fc_q/fc_k weights (incl. key bias & 1/sqrt(D))
    imp_ref: (1, p_pad)    lane-dense importance row (padded lanes are 0)
    """
    X = x_ref[...]
    # Two MXU matmuls, both contracting over D+1; no explicit transpose
    # (dot_general contracts the trailing dims of both operands).
    Y = jnp.dot(X, m_ref[...], preferred_element_type=jnp.float32)        # (p_pad, D+1)
    A = jax.lax.dot_general(Y, X, (((1,), (1,)), ((), ())),
                            preferred_element_type=jnp.float32)            # (p_pad, p_pad)

    # Mask padded columns so they get zero probability, then stable softmax.
    col_ids = jax.lax.broadcasted_iota(jnp.int32, (1, p_pad), 1)
    A = jnp.where(col_ids < n_valid, A, _NEG_INF)
    A = A - jnp.max(A, axis=-1, keepdims=True)
    E = jnp.exp(A)
    Pm = E * pl.reciprocal(jnp.sum(E, axis=-1, keepdims=True), approx=True)

    # Drop padded rows, then patch importance = sum over rows (dim 0).
    row_ids = jax.lax.broadcasted_iota(jnp.int32, (p_pad, 1), 0)
    Pm = jnp.where(row_ids < n_valid, Pm, 0.0)
    imp_ref[...] = jnp.sum(Pm, axis=0, keepdims=True)


def attention_importance(x_aug, m_aug, n_valid):
    """x_aug: (B, p_pad, D+1) f32, m_aug: (D+1, D+1) f32 -> (B, p_pad) importance."""
    B, p_pad, d_aug = x_aug.shape
    kernel = functools.partial(_attention_importance_kernel,
                               n_valid=n_valid, p_pad=p_pad)
    out = pl.pallas_call(
        kernel,
        out_shape=jax.ShapeDtypeStruct((B, 1, p_pad), jnp.float32),
        grid=(B,),
        in_specs=[
            pl.BlockSpec((None, p_pad, d_aug), lambda b: (b, 0, 0)),   # per-frame patches
            pl.BlockSpec((d_aug, d_aug), lambda b: (0, 0)),            # shared folded weights
        ],
        out_specs=pl.BlockSpec((None, 1, p_pad), lambda b: (b, 0, 0)),  # lane-dense row
        compiler_params=pltpu.CompilerParams(
            # Batch axis is embarrassingly parallel -> sharded across the two
            # TensorCores on v7x; no effect on single-TC v5e/v6e.
            dimension_semantics=("parallel",)),
    )(x_aug, m_aug)
    return out[:, 0, :]


# -------------------------------- Agent glue -------------------------------- #
class CarRacingAgentPallas:
    def __init__(self, image_size, query_dim, output_dim, output_activation,
                 num_hidden, patch_size, patch_stride, top_k, data_dim,
                 normalize_positions=True, seed=0):
        self.image_size = image_size
        self.patch_size = patch_size
        self.patch_stride = patch_stride
        self.top_k = top_k
        self.data_dim = data_dim
        self.normalize_positions = normalize_positions

        n = int((image_size - patch_size) / patch_stride + 1)
        self.n = n
        self.num_patches = n * n
        self.feat_dim = data_dim * patch_size ** 2
        # Pad patch count to a multiple of 128 -> lane-dense output & aligned tiles.
        self.p_pad = ((self.num_patches + 127) // 128) * 128

        offset = patch_size // 2
        centers = [[offset + i * patch_stride, offset + j * patch_stride]
                   for i in range(n) for j in range(n)]
        self.patch_centers = jnp.asarray(centers, dtype=jnp.float32)       # (P, 2)

        # Gather tables replicating torch unfold/permute/reshape ordering:
        # patch p = i*n + j, flattened per patch as (h, w, c) row-major.
        rows = np.zeros((n * n, patch_size, patch_size), np.int32)
        cols = np.zeros((n * n, patch_size, patch_size), np.int32)
        for i in range(n):
            for j in range(n):
                p = i * n + j
                rows[p] = (i * patch_stride + np.arange(patch_size))[:, None]
                cols[p] = (j * patch_stride + np.arange(patch_size))[None, :]
        self._row_idx = jnp.asarray(rows)
        self._col_idx = jnp.asarray(cols)

        # Deterministic nn.Linear-style init for fc_q / fc_k.
        D, Qd = self.feat_dim, query_dim
        key = jax.random.PRNGKey(seed)
        kq, kqb, kk, kkb = jax.random.split(key, 4)
        bound = 1.0 / math.sqrt(D)
        self.wq = jax.random.uniform(kq, (D, Qd), jnp.float32, -bound, bound)
        self.bq = jax.random.uniform(kqb, (1, Qd), jnp.float32, -bound, bound)
        self.wk = jax.random.uniform(kk, (D, Qd), jnp.float32, -bound, bound)
        self.bk = jax.random.uniform(kkb, (1, Qd), jnp.float32, -bound, bound)

        # Fold fc_q, fc_k, key bias and the 1/sqrt(D) scale into one matrix:
        #   A = (X Wq + bq)(X Wk + bk)^T / sqrt(D)
        #     = X M X^T + 1 (bq Wk^T X^T) + row-constant terms  (row consts cancel in softmax)
        # with M = Wq Wk^T / sqrt(D).  Augmenting X with a ones column folds the
        # remaining column bias into a single (D+1, D+1) weight (last column zero).
        scale = 1.0 / math.sqrt(float(D))
        M = (self.wq @ self.wk.T) * scale                                  # (D, D)
        wv = (self.bq @ self.wk.T) * scale                                 # (1, D)
        m_aug = jnp.zeros((D + 1, D + 1), jnp.float32)
        m_aug = m_aug.at[:D, :D].set(M)
        m_aug = m_aug.at[D, :D].set(wv[0])
        self.m_aug = m_aug

        # TODO(synk): LSTMController is never invoked by CarRacingAgent.forward();
        # it is intentionally not ported.

        self._forward_impl = jax.jit(self._make_forward())

    # --------------------------------------------------------------- glue ---
    def extract_patches_batch(self, x_bchw):
        """(B, C, H, W) -> (B, P, C*ps*ps); same ordering as the torch unfold path."""
        x = jnp.transpose(x_bchw, (0, 2, 3, 1))                            # (B, H, W, C)
        patches = x[:, self._row_idx, self._col_idx, :]                    # (B, P, ps, ps, C)
        return patches.reshape(x.shape[0], self.num_patches, self.feat_dim)

    def _make_forward(self):
        P, D, p_pad = self.num_patches, self.feat_dim, self.p_pad
        top_k, img = self.top_k, float(self.image_size)
        norm = self.normalize_positions
        m_aug, centers = self.m_aug, self.patch_centers

        def fwd(x_bchw):
            B = x_bchw.shape[0]
            X = self.extract_patches_batch(x_bchw).astype(jnp.float32)    # (B, P, D)
            # Zero-pad rows to p_pad and append the ones (bias) column.
            x_aug = jnp.zeros((B, p_pad, D + 1), jnp.float32)
            x_aug = x_aug.at[:, :, D].set(1.0)
            x_aug = x_aug.at[:, :P, :D].set(X)
            imp = attention_importance(x_aug, m_aug, P)[:, :P]             # (B, P)
            _, top_ix = jax.lax.top_k(imp, top_k)                          # (B, k) descending
            sel = centers[top_ix].reshape(B, 2 * top_k)                    # (B, 2k)
            if norm:
                sel = sel / img
            return sel, imp

        return fwd

    def forward_batch(self, x_bchw):
        return self._forward_impl(x_bchw)[0]

    def forward(self, x_chw):
        return self._forward_impl(x_chw[None])[0][0]

    def patch_importance(self, x_bchw):
        return self._forward_impl(x_bchw)[1]


# ----------------------------------- main ----------------------------------- #
if __name__ == "__main__":
    image_size = 16
    patch_size = 4
    patch_stride = 2
    data_dim = 3       # channels
    query_dim = 8
    top_k = 4
    batch = 8

    agent = CarRacingAgentPallas(
        image_size=image_size,
        query_dim=query_dim,
        output_dim=3,
        output_activation="tanh",
        num_hidden=16,
        patch_size=patch_size,
        patch_stride=patch_stride,
        top_k=top_k,
        data_dim=data_dim,
        normalize_positions=True,
        seed=0,
    )

    key = jax.random.PRNGKey(0)
    x = jax.random.uniform(key, (batch, data_dim, image_size, image_size), jnp.float32)

    centers = agent.forward_batch(x)
    jax.block_until_ready(centers)
    assert centers.shape == (batch, top_k * 2)

    # Single-frame path (matches the original module's forward signature).
    c0 = agent.forward(x[0])
    jax.block_until_ready(c0)
    assert c0.shape == (top_k * 2,)

    # Numeric check of the Pallas importance against the original (unfolded) math.
    Xp = agent.extract_patches_batch(x)
    Q = Xp @ agent.wq + agent.bq
    K = Xp @ agent.wk + agent.bk
    A_ref = jnp.einsum("bpq,bkq->bpk", Q, K) / math.sqrt(Xp.shape[-1])
    imp_ref = jax.nn.softmax(A_ref, axis=-1).sum(axis=1)
    imp_pal = agent.patch_importance(x)
    assert jnp.allclose(imp_pal, imp_ref, rtol=2e-2, atol=2e-2), float(
        jnp.max(jnp.abs(imp_pal - imp_ref)))

    print("KERNEL_OK")
</pallas_src>

<mosaic_0001>
module attributes {stable_mosaic.version = 11 : i64} {
  func.func @_attention_importance_kernel(%arg0: i32, %arg1: memref<1x128x49xf32, #tpu.memory_space<vmem>>, %arg2: memref<49x49xf32, #tpu.memory_space<vmem>>, %arg3: memref<1x1x128xf32, #tpu.memory_space<vmem>>) attributes {dimension_semantics = [#tpu.dimension_semantics<parallel>], iteration_bounds = array<i64: 8>, scalar_prefetch = 0 : i64, scratch_operands = 0 : i64, tpu.core_type = #tpu.core_type<tc>, window_params = [{transform_indices = @transform_0, window_bounds = array<i64: 1, 128, 49>}, {pipeline_mode = #tpu.pipeline_mode<synchronous>, transform_indices = @transform_1, window_bounds = array<i64: 49, 49>}, {transform_indices = @transform_2, window_bounds = array<i64: 1, 1, 128>}]} {
    %c0 = arith.constant 0 : index
    %c0_0 = arith.constant 0 : index
    %c0_1 = arith.constant 0 : index
    %0 = vector.load %arg1[%c0, %c0_0, %c0_1] : memref<1x128x49xf32, #tpu.memory_space<vmem>>, vector<1x128x49xf32>
    %1 = vector.shape_cast %0 : vector<1x128x49xf32> to vector<128x49xf32>
    %c0_2 = arith.constant 0 : index
    %c0_3 = arith.constant 0 : index
    %2 = vector.load %arg2[%c0_2, %c0_3] : memref<49x49xf32, #tpu.memory_space<vmem>>, vector<49x49xf32>
    %cst = arith.constant dense<0.000000e+00> : vector<128x49xf32>
    %3 = tpu.matmul %1, %2, %cst {dimension_numbers = #tpu.dot_dimension_numbers<[1], [0], [0], [1], [0, 0, 1, 1], [], []>} : vector<128x49xf32>, vector<49x49xf32>, vector<128x49xf32> -> vector<128x49xf32>
    %cst_4 = arith.constant dense<0.000000e+00> : vector<128x128xf32>
    %4 = tpu.matmul %3, %1, %cst_4 {dimension_numbers = #tpu.dot_dimension_numbers<[1], [1], [0], [0], [0, 0, 1, 0], [], []>} : vector<128x49xf32>, vector<128x49xf32>, vector<128x128xf32> -> vector<128x128xf32>
    %5 = tpu.iota {dimensions = array<i32: 1>} : vector<1x128xi32>
    %c49_i32 = arith.constant 49 : i32
    %6 = vector.broadcast %c49_i32 : i32 to vector<1x128xi32>
    %7 = arith.cmpi slt, %5, %6 : vector<1x128xi32>
    %cst_5 = arith.constant -1.000000e+30 : f32
    %8 = vector.shape_cast %7 : vector<1x128xi1> to vector<1x128xi1>
    %9 = vector.broadcast %8 : vector<1x128xi1> to vector<128x128xi1>
    %10 = vector.broadcast %cst_5 : f32 to vector<128x128xf32>
    %11 = arith.select %9, %4, %10 : vector<128x128xi1>, vector<128x128xf32>
    %cst_6 = arith.constant dense<0xFF800000> : vector<128xf32>
    %12 = vector.multi_reduction <maximumf>, %11, %cst_6 [1] : vector<128x128xf32> to vector<128xf32>
    %13 = vector.shape_cast %12 : vector<128xf32> to vector<128x1xf32>
    %14 = vector.broadcast %13 : vector<128x1xf32> to vector<128x128xf32>
    %15 = arith.subf %11, %14 : vector<128x128xf32>
    %16 = math.exp %15 : vector<128x128xf32>
    %cst_7 = arith.constant dense<0.000000e+00> : vector<128xf32>
    %17 = vector.multi_reduction <add>, %16, %cst_7 [1] : vector<128x128xf32> to vector<128xf32>
    %18 = vector.shape_cast %17 : vector<128xf32> to vector<128x1xf32>
    %19 = tpu.reciprocal %18 {approx = true} : vector<128x1xf32> -> vector<128x1xf32>
    %20 = vector.broadcast %19 : vector<128x1xf32> to vector<128x128xf32>
    %21 = arith.mulf %16, %20 : vector<128x128xf32>
    %22 = tpu.iota {dimensions = array<i32: 0>} : vector<128x1xi32>
    %c49_i32_8 = arith.constant 49 : i32
    %23 = vector.broadcast %c49_i32_8 : i32 to vector<128x1xi32>
    %24 = arith.cmpi slt, %22, %23 : vector<128x1xi32>
    %cst_9 = arith.constant 0.000000e+00 : f32
    %25 = vector.shape_cast %24 : vector<128x1xi1> to vector<128x1xi1>
    %26 = vector.broadcast %25 : vector<128x1xi1> to vector<128x128xi1>
    %27 = vector.broadcast %cst_9 : f32 to vector<128x128xf32>
    %28 = arith.select %26, %21, %27 : vector<128x128xi1>, vector<128x128xf32>
    %cst_10 = arith.constant dense<0.000000e+00> : vector<128xf32>
    %29 = vector.multi_reduction <add>, %28, %cst_10 [0] : vector<128x128xf32> to vector<128xf32>
    %30 = vector.shape_cast %29 : vector<128xf32> to vector<1x128xf32>
    %c0_11 = arith.constant 0 : index
    %c0_12 = arith.constant 0 : index
    %c0_13 = arith.constant 0 : index
    %31 = vector.load %arg3[%c0_11, %c0_12, %c0_13] : memref<1x1x128xf32, #tpu.memory_space<vmem>>, vector<1x1x128xf32>
    %32 = vector.shape_cast %31 : vector<1x1x128xf32> to vector<1x128xf32>
    %33 = vector.shape_cast %30 : vector<1x128xf32> to vector<1x1x128xf32>
    tpu.vector_store %arg3[%c0_11, %c0_12, %c0_13], %33 {strides = array<i32>} : memref<1x1x128xf32, #tpu.memory_space<vmem>>, vector<1x1x128xf32>,
    return
  }
  func.func @transform_0(%arg0: i32) -> (i32, i32, i32) {
    %c0_i32 = arith.constant 0 : i32
    %c0_i32_0 = arith.constant 0 : i32
    %c0_i32_1 = arith.constant 0 : i32
    return %arg0, %c0_i32, %c0_i32_0 : i32, i32, i32
  }
  func.func @transform_1(%arg0: i32) -> (i32, i32) {
    %c0_i32 = arith.constant 0 : i32
    %c0_i32_0 = arith.constant 0 : i32
    %c0_i32_1 = arith.constant 0 : i32
    return %c0_i32, %c0_i32_0 : i32, i32
  }
  func.func @transform_2(%arg0: i32) -> (i32, i32, i32) {
    %c0_i32 = arith.constant 0 : i32
    %c0_i32_0 = arith.constant 0 : i32
    %c0_i32_1 = arith.constant 0 : i32
    return %arg0, %c0_i32, %c0_i32_0 : i32, i32, i32
  }
}

</mosaic_0001>

<bundles_post_ra>
// kernel: fwd.1
= control target key start
LH: loop header
LB: loop body
LE: loop exit
PB: predicated region body
PF: predicated region fallthrough
CT: control target
= control target key end

     0   :  { %s1168_s9 = smov 0   ;;  %s1375_s0 = inlined_call_operand.vmem [shape: f32[8,128,49], index: 0, kind: input, shape index: {}]   ;;  %s1376_s1 = inlined_call_operand.vmem [shape: f32[49,49], index: 1, kind: input, shape index: {}]   ;;  %s1377_s2 = inlined_call_operand.vmem [shape: f32[8,1,128], index: 2, kind: output, shape index: {}]  }
   0x1 LB: > { %s869_s10 = sadd.s32 4294967295, %s1151_s9   ;;  %p873_p0 = scmp.ge.s32.totalorder %s1151_s9, 1  ;;  %s1151_s9 = sphi %s1168_s9, %s12_s9  }
   0x2   : > { %p112_p1 = scmp.lt.s32.totalorder %s1151_s9, 9 }
   0x4   : > { %p113_p2 = pnand %p873_p0, %p112_p1 }
   0x5   : > { %p132_p3 = scmp.lt.s32.totalorder (!%p113_p2), %s869_s10, 7 }
   0x6   : > { %116 = sbr.rel (%p113_p2) target bundleno = 758 (0x2f6), region = 28 }
   0xb   : > { %v162_v0 = vld [vmem:[%s1376_s1 + $0x30] sm:$0x1]  ;;  %vm212_vm0 = vcmask 1040384   ;;  %v161_v1 = vld [vmem:[%s1376_s1 + $0x28] sm:$0xff]  ;;  %v160_v2 = vld [vmem:[%s1376_s1 + $0x20] sm:$0xff]  ;;  %s1379_s10 = smov (!%p132_p3, %s869_s10), 7  ;;  %v554_v39 = vlaneseq }
   0xc   : > { %983 = vmatprep.subr.msk.mxu0 %vm212_vm0, %v162_v0  ;;  %v159_v3 = vld [vmem:[%s1376_s1 + $0x18] sm:$0xff]  ;;  %s927_s19 = sshll.u32 %s1379_s10, 7  ;;  %vm163_vm1 = vcmask 400384   ;;  %v158_v4 = vld [vmem:[%s1376_s1 + $0x10] sm:$0xff]  ;;  %v157_v6 = vld [vmem:[%s1376_s1 + $0x8] sm:$0xff]  ;;  %s139_s3 = scalar_lea.vmem %s1377_s2, %s1379_s10 }
   0xd   : > { %984 = vmatpush3.msk.msra.mxu0 %vm212_vm0, %v162_v0  ;;  %s1194_s22 = scalar_lea.vmem %s1375_s0, %s927_s19  ;;  %v156_v8 = vld [vmem:[%s1376_s1] sm:$0xff]  ;;  %v555_v40 = vand.u32 127, %v554_v39 }
   0xe   : > { %985 = vmatprep.subr.mxu0 %v161_v1  ;;  %v1200_v5 = vld [vmem:[%s1194_s22] sm:$0xff]  ;;  %v1208_v7 = vld [vmem:[%s1194_s22 + $0x78] sm:$0xff]  ;;  %v154_v9 = vld [vmem:[%s1194_s22 + $0x70] sm:$0xff] }
   0xf   : > { %986 = vmatpush3.msra.mxu0 %v161_v1  ;;  %997 = vmatprep.mubr.msk.f32.mxu0 %vm163_vm1, %v1200_v5  ;;  %v1220_v10 = vld [vmem:[%s1194_s22 + $0x8] sm:$0xff]  ;;  %v1223_v11 = vld [vmem:[%s1194_s22 + $0x10] sm:$0xff]  ;;  %v1233_v12 = vld [vmem:[%s1194_s22 + $0x18] sm:$0xff]  ;;  %vm556_vm2 = vcmp.lt.s32.totalorder %v555_v40, 49 }
  0x10   : > { %987 = vmatprep.subr.mxu0 %v160_v2  ;;  %1077 = vmatprep.subr.msk.mxu1 %vm163_vm1, %v1208_v7  ;;  %v153_v13 = vld [vmem:[%s1194_s22 + $0x68] sm:$0xff]  ;;  %v1239_v14 = vld [vmem:[%s1194_s22 + $0x20] sm:$0xff]  ;;  %v146_v17 = vld [vmem:[%s1194_s22 + $0x30] sm:$0xff] }
  0x11   : > { %988 = vmatpush3.msra.mxu0 %v160_v2  ;;  %1093 = vmatpush3.xpose.msk.msra.mxu1 %vm163_vm1, %v1208_v7  ;;  %v152_v15 = vld [vmem:[%s1194_s22 + $0x60] sm:$0xff]  ;;  %v145_v16 = vld [vmem:[%s1194_s22 + $0x28] sm:$0xff]  ;;  %v151_v18 = vld [vmem:[%s1194_s22 + $0x58] sm:$0xff] }
  0x12   : > { %989 = vmatprep.subr.mxu0 %v159_v3  ;;  %1078 = vmatprep.subr.msk.mxu1 %vm163_vm1, %v154_v9  ;;  %v147_v19 = vld [vmem:[%s1194_s22 + $0x38] sm:$0xff]  ;;  %v150_v20 = vld [vmem:[%s1194_s22 + $0x50] sm:$0xff]  ;;  %v148_v21 = vld [vmem:[%s1194_s22 + $0x40] sm:$0xff] }
  0x13   : > { %990 = vmatpush3.msra.mxu0 %v159_v3  ;;  %v149_v22 = vld [vmem:[%s1194_s22 + $0x48] sm:$0xff] }
  0x14   : > { %991 = vmatprep.subr.mxu0 %v158_v4 }
  0x15   : > { %992 = vmatpush3.msra.mxu0 %v158_v4  ;;  %1094 = vmatpush3.xpose.msk.msra.mxu1 %vm163_vm1, %v154_v9 }
  0x16   : > { %993 = vmatprep.subr.mxu0 %v157_v6  ;;  %1079 = vmatprep.subr.msk.mxu1 %vm163_vm1, %v153_v13 }
  0x17   : > { %994 = vmatpush3.msra.mxu0 %v157_v6 }
  0x18   : > { %995 = vmatprep.subr.mxu0 %v156_v8 }
  0x19   : > { %996 = vmatpush3.msra.mxu0 %v156_v8  ;;  %1095 = vmatpush3.xpose.msk.msra.mxu1 %vm163_vm1, %v153_v13 }
  0x1a   : > { %998 = vmatmul.mubr.msk.f32.vlgmr.msra.gmra.mxu0 %vm163_vm1, %v1220_v10  ;;  %1021 = vmatprep.subr.msk.mxu0 %vm163_vm1, %v1208_v7 }
  0x1b   : > { %1000 = vmatprep.mubr.msk.f32.mxu0 %vm163_vm1, %v1223_v11  ;;  %1022 = vmatpush3.xpose.msk.msra.mxu0 %vm163_vm1, %v1208_v7 }
  0x1c   : > { %1023 = vmatprep.subr.msk.mxu0 %vm163_vm1, %v154_v9  ;;  %1080 = vmatprep.subr.msk.mxu1 %vm163_vm1, %v152_v15 }
  0x1d   : > { %1096 = vmatpush3.xpose.msk.msra.mxu1 %vm163_vm1, %v152_v15 }
  0x1e   : > { %1001 = vmatmul.mubr.msk.f32.gmra.mxu0 %vm163_vm1, %v1233_v12  ;;  %1081 = vmatprep.subr.msk.mxu1 %vm163_vm1, %v151_v18 }
  0x1f   : > { %1003 = vmatprep.mubr.msk.f32.mxu0 %vm163_vm1, %v1239_v14  ;;  %1024 = vmatpush3.xpose.msk.msra.mxu0 %vm163_vm1, %v154_v9 }
  0x20   : > { %1025 = vmatprep.subr.msk.mxu0 %vm163_vm1, %v153_v13 }
  0x21   : > { %1097 = vmatpush3.xpose.msk.msra.mxu1 %vm163_vm1, %v151_v18 }
  0x22   : > { %1004 = vmatmul.mubr.msk.f32.gmra.mxu0 %vm163_vm1, %v145_v16  ;;  %1082 = vmatprep.subr.msk.mxu1 %vm163_vm1, %v150_v20 }
  0x23   : > { %1006 = vmatprep.mubr.msk.f32.mxu0 %vm163_vm1, %v146_v17  ;;  %1026 = vmatpush3.xpose.msk.msra.mxu0 %vm163_vm1, %v153_v13 }
  0x24   : > { %1027 = vmatprep.subr.msk.mxu0 %vm163_vm1, %v152_v15 }
  0x25   : > { %1098 = vmatpush3.xpose.msk.msra.mxu1 %vm163_vm1, %v150_v20 }
  0x26   : > { %1007 = vmatmul.mubr.msk.f32.gmra.mxu0 %vm163_vm1, %v147_v19  ;;  %1083 = vmatprep.subr.msk.mxu1 %vm163_vm1, %v149_v22 }
  0x27   : > { %1028 = vmatpush3.xpose.msk.msra.mxu0 %vm163_vm1, %v152_v15  ;;  %1009 = vmatprep.mubr.msk.f32.mxu0 %vm163_vm1, %v148_v21 }
  0x28   : > { %1029 = vmatprep.subr.msk.mxu0 %vm163_vm1, %v151_v18 }
  0x29   : > { %1099 = vmatpush3.xpose.msk.msra.mxu1 %vm163_vm1, %v149_v22 }
  0x2a   : > { %1010 = vmatmul.mubr.msk.f32.gmra.mxu0 %vm163_vm1, %v149_v22  ;;  %1084 = vmatprep.subr.msk.mxu1 %vm163_vm1, %v148_v21 }
  0x2b   : > { %1030 = vmatpush3.xpose.msk.msra.mxu0 %vm163_vm1, %v151_v18  ;;  %1012 = vmatprep.mubr.msk.f32.mxu0 %vm163_vm1, %v150_v20 }
  0x2c   : > { %1031 = vmatprep.subr.msk.mxu0 %vm163_vm1, %v150_v20 }
  0x2d   : > { %1100 = vmatpush3.xpose.msk.msra.mxu1 %vm163_vm1, %v148_v21 }
  0x2e   : > { %1013 = vmatmul.mubr.msk.f32.gmra.mxu0 %vm163_vm1, %v151_v18  ;;  %1085 = vmatprep.subr.msk.mxu1 %vm163_vm1, %v147_v19 }
  0x2f   : > { %1032 = vmatpush3.xpose.msk.msra.mxu0 %vm163_vm1, %v150_v20  ;;  %1015 = vmatprep.mubr.msk.f32.mxu0 %vm163_vm1, %v152_v15 }
  0x30   : > { %1033 = vmatprep.subr.msk.mxu0 %vm163_vm1, %v149_v22 }
  0x31   : > { %1101 = vmatpush3.xpose.msk.msra.mxu1 %vm163_vm1, %v147_v19 }
  0x32   : > { %1016 = vmatmul.mubr.msk.f32.gmra.mxu0 %vm163_vm1, %v153_v13  ;;  %1086 = vmatprep.subr.msk.mxu1 %vm163_vm1, %v146_v17 }
  0x33   : > { %1034 = vmatpush3.xpose.msk.msra.mxu0 %vm163_vm1, %v149_v22  ;;  %1018 = vmatprep.mubr.msk.f32.mxu0 %vm163_vm1, %v154_v9 }
  0x34   : > { %1035 = vmatprep.subr.msk.mxu0 %vm163_vm1, %v148_v21 }
  0x35   : > { %1102 = vmatpush3.xpose.msk.msra.mxu1 %vm163_vm1, %v146_v17 }
  0x36   : > { %1019 = vmatmul.mubr.msk.f32.gmra.mxu0 %vm163_vm1, %v1208_v7  ;;  %1087 = vmatprep.subr.msk.mxu1 %vm163_vm1, %v145_v16 }
  0x37   : > { %1036 = vmatpush3.xpose.msk.msra.mxu0 %vm163_vm1, %v148_v21 }
  0x38   : > { %1037 = vmatprep.subr.msk.mxu0 %vm163_vm1, %v147_v19 }
  0x39   : > { %1103 = vmatpush3.xpose.msk.msra.mxu1 %vm163_vm1, %v145_v16 }
  0x3a   : > { %1088 = vmatprep.subr.msk.mxu1 %vm163_vm1, %v1239_v14 }
  0x3b   : > { %1038 = vmatpush3.xpose.msk.msra.mxu0 %vm163_vm1, %v147_v19 }
  0x3c   : > { %1039 = vmatprep.subr.msk.mxu0 %vm163_vm1, %v146_v17 }
  0x3d   : > { %1104 = vmatpush3.xpose.msk.msra.mxu1 %vm163_vm1, %v1239_v14 }
  0x3e   : > { %1089 = vmatprep.subr.msk.mxu1 %vm163_vm1, %v1233_v12 }
  0x3f   : > { %1040 = vmatpush3.xpose.msk.msra.mxu0 %vm163_vm1, %v146_v17 }
  0x40   : > { %1041 = vmatprep.subr.msk.mxu0 %vm163_vm1, %v145_v16 }
  0x41   : > { %1105 = vmatpush3.xpose.msk.msra.mxu1 %vm163_vm1, %v1233_v12 }
  0x42   : > { %1090 = vmatprep.subr.msk.mxu1 %vm163_vm1, %v1223_v11 }
  0x43   : > { %1042 = vmatpush3.xpose.msk.msra.mxu0 %vm163_vm1, %v145_v16 }
  0x44   : > { %1043 = vmatprep.subr.msk.mxu0 %vm163_vm1, %v1239_v14 }
  0x45   : > { %1106 = vmatpush3.xpose.msk.msra.mxu1 %vm163_vm1, %v1223_v11 }
  0x46   : > { %1091 = vmatprep.subr.msk.mxu1 %vm163_vm1, %v1220_v10 }
  0x47   : > { %1044 = vmatpush3.xpose.msk.msra.mxu0 %vm163_vm1, %v1239_v14 }
  0x48   : > { %1045 = vmatprep.subr.msk.mxu0 %vm163_vm1, %v1233_v12 }
  0x49   : > { %1107 = vmatpush3.xpose.msk.msra.mxu1 %vm163_vm1, %v1220_v10 }
  0x4a   : > { %1092 = vmatprep.subr.msk.mxu1 %vm163_vm1, %v1200_v5 }
  0x4b   : > { %1046 = vmatpush3.xpose.msk.msra.mxu0 %vm163_vm1, %v1233_v12 }
  0x4c   : > { %1047 = vmatprep.subr.msk.mxu0 %vm163_vm1, %v1223_v11 }
  0x4d   : > { %1108 = vmatpush3.xpose.msk.msra.mxu1 %vm163_vm1, %v1200_v5 }
  0x4f   : > { %1048 = vmatpush3.xpose.msk.msra.mxu0 %vm163_vm1, %v1223_v11 }
  0x50   : > { %1049 = vmatprep.subr.msk.mxu0 %vm163_vm1, %v1220_v10 }
  0x53   : > { %1050 = vmatpush3.xpose.msk.msra.mxu0 %vm163_vm1, %v1220_v10 }
  0x54   : > { %1051 = vmatprep.subr.msk.mxu0 %vm163_vm1, %v1200_v5 }
  0x57   : > { %1052 = vmatpush3.xpose.msk.msra.mxu0 %vm163_vm1, %v1200_v5 }
  0xda   : > { %v999_v23 = vpop.f32.mrf.mxu0 }
  0xdc   : > { %v282_v24 = vpop.f32.mrf.mxu0 }
  0xdd   : > { %1053 = vmatprep.mubr.msk.f32.mxu0 %vm163_vm1, %v282_v24 }
  0xde   : > { %v1002_v25 = vpop.f32.mrf.mxu0  ;;  %1054 = vmatmul.mubr.msk.f32.vlgmr.msra.gmra.mxu0 %vm163_vm1, %v999_v23 }
  0xe0   : > { %v292_v26 = vpop.f32.mrf.mxu0 }
  0xe1   : > { %1056 = vmatprep.mubr.msk.f32.mxu0 %vm163_vm1, %v292_v26 }
  0xe2   : > { %v1005_v27 = vpop.f32.mrf.mxu0  ;;  %1057 = vmatmul.mubr.msk.f32.gmra.mxu0 %vm163_vm1, %v1002_v25 }
  0xe4   : > { %v302_v28 = vpop.f32.mrf.mxu0 }
  0xe5   : > { %1059 = vmatprep.mubr.msk.f32.mxu1 %vm163_vm1, %v302_v28 }
  0xe6   : > { %v1008_v29 = vpop.f32.mrf.mxu0  ;;  %1060 = vmatmul.mubr.msk.f32.vlgmr.msra.gmra.mxu1 %vm163_vm1, %v1005_v27 }
  0xe8   : > { %v312_v30 = vpop.f32.mrf.mxu0 }
  0xe9   : > { %1062 = vmatprep.mubr.msk.f32.mxu1 %vm163_vm1, %v312_v30 }
  0xea   : > { %1063 = vmatmul.mubr.msk.f32.gmra.mxu1 %vm163_vm1, %v1008_v29  ;;  %v1011_v31 = vpop.f32.mrf.mxu0 }
  0xec   : > { %v322_v32 = vpop.f32.mrf.mxu0 }
  0xed   : > { %1065 = vmatprep.mubr.msk.f32.mxu1 %vm163_vm1, %v322_v32 }
  0xee   : > { %v1014_v33 = vpop.f32.mrf.mxu0  ;;  %1066 = vmatmul.mubr.msk.f32.gmra.mxu1 %vm163_vm1, %v1011_v31 }
  0xf0   : > { %v332_v34 = vpop.f32.mrf.mxu0 }
  0xf1   : > { %1068 = vmatprep.mubr.msk.f32.mxu1 %vm163_vm1, %v332_v34 }
  0xf2   : > { %v1017_v35 = vpop.f32.mrf.mxu0  ;;  %1069 = vmatmul.mubr.msk.f32.gmra.mxu1 %vm163_vm1, %v1014_v33 }
  0xf4   : > { %v342_v36 = vpop.f32.mrf.mxu0 }
  0xf5   : > { %1071 = vmatprep.mubr.msk.f32.mxu1 %vm163_vm1, %v342_v36 }
  0xf6   : > { %v1020_v37 = vpop.f32.mrf.mxu0  ;;  %1072 = vmatmul.mubr.msk.f32.gmra.mxu1 %vm163_vm1, %v1017_v35 }
  0xf8   : > { %v352_v38 = vpop.f32.mrf.mxu0 }
  0xf9   : > { %1074 = vmatprep.mubr.msk.f32.mxu1 %vm163_vm1, %v352_v38 }
  0xfa   : > { %1075 = vmatmul.mubr.msk.f32.gmra.mxu1 %vm163_vm1, %v1020_v37 }
 0x19e   : > { %v1055_v41 = vpop.f32.mrf.mxu0 }
 0x19f   : > { %v560_v46 = vsel %vm556_vm2, %v1055_v41, -1e+30  ;;  %v720_v41 = vshrl.u32 %v554_v39, 7 }
 0x1a0   : > { %v475_v42 = vpop.f32.mrf.mxu0 }
 0x1a1   : > { %v559_v43 = vsel %vm556_vm2, %v475_v42, -1e+30 }
 0x1a2   : > { %575 = vmax.xlane.f32.xlu0 %v559_v43  ;;  %v1058_v44 = vpop.f32.mrf.mxu0 }
 0x1a3   : > { %v562_v51 = vsel %vm556_vm2, %v1058_v44, -1e+30 }
 0x1a4   : > { %v485_v45 = vpop.f32.mrf.mxu0 }
 0x1a5   : > { %v561_v47 = vsel %vm556_vm2, %v485_v45, -1e+30 }
 0x1a6   : > { %v1061_v48 = vpop.f32.mrf.mxu1  ;;  %577 = vmax.xlane.f32.xlu0 %v560_v46  ;;  %579 = vmax.xlane.f32.xlu1 %v561_v47 }
 0x1a7   : > { %v564_v55 = vsel %vm556_vm2, %v1061_v48, -1e+30  ;;  %v726_v48 = vadd.s32 48, %v720_v41 }
 0x1a8   : > { %v495_v49 = vpop.f32.mrf.mxu1 }
 0x1a9   : > { %v563_v50 = vsel %vm556_vm2, %v495_v49, -1e+30  ;;  %vm742_vm3 = vcmp.lt.s32.totalorder %v726_v48, 49 }
 0x1aa   : > { %v1064_v52 = vpop.f32.mrf.mxu1  ;;  %583 = vmax.xlane.f32.xlu0 %v563_v50  ;;  %581 = vmax.xlane.f32.xlu1 %v562_v51 }
 0x1ac   : > { %v505_v53 = vpop.f32.mrf.mxu1 }
 0x1ad   : > { %v565_v54 = vsel %vm556_vm2, %v505_v53, -1e+30 }
 0x1ae   : > { %587 = vmax.xlane.f32.xlu0 %v565_v54  ;;  %585 = vmax.xlane.f32.xlu1 %v564_v55  ;;  %v1067_v56 = vpop.f32.mrf.mxu1 }
 0x1b0   : > { %v515_v57 = vpop.f32.mrf.mxu1 }
 0x1b2   : > { %v1070_v58 = vpop.f32.mrf.mxu1 }
 0x1b4   : > { %v525_v59 = vpop.f32.mrf.mxu1 }
 0x1b6   : > { %v1073_v60 = vpop.f32.mrf.mxu1 }
 0x1b8   : > { %v535_v61 = vpop.f32.mrf.mxu1 }
 0x1ba   : > { %v1076_v62 = vpop.f32.mrf.mxu1 }
 0x1bc   : > { %v545_v63 = vpop.f32.mrf.mxu1 }
 0x22b   : > { %v576_v0 = vpop.xlane.xlu0 %575 }
 0x22c   : > { %v607_v1 = vsub.f32 %v559_v43, %v576_v0 }
 0x22e   : > { %v623_v2 = vmul.f32 1.442695, %v607_v1 }
 0x22f   : > { %v578_v3 = vpop.xlane.xlu0 %577  ;;  %v580_v4 = vpop.xlane.xlu1 %579 }
 0x230   : > { %1117 = vpow2.f32 %v623_v2  ;;  %v608_v5 = vsub.f32 %v560_v46, %v578_v3  ;;  %v609_v6 = vsub.f32 %v561_v47, %v580_v4 }
 0x232   : > { %v625_v7 = vmul.f32 1.442695, %v608_v5  ;;  %v627_v8 = vmul.f32 1.442695, %v609_v6 }
 0x233   : > { %v584_v9 = vpop.xlane.xlu0 %583  ;;  %v582_v10 = vpop.xlane.xlu1 %581 }
 0x234   : > { %1119 = vpow2.f32 %v625_v7  ;;  %v611_v11 = vsub.f32 %v563_v50, %v584_v9  ;;  %v610_v12 = vsub.f32 %v562_v51, %v582_v10 }
 0x235   : > { %1121 = vpow2.f32 %v627_v8 }
 0x236   : > { %v631_v13 = vmul.f32 1.442695, %v611_v11  ;;  %v629_v14 = vmul.f32 1.442695, %v610_v12 }
 0x237   : > { %v588_v15 = vpop.xlane.xlu0 %587  ;;  %v586_v16 = vpop.xlane.xlu1 %585 }
 0x238   : > { %1123 = vpow2.f32 %v631_v13  ;;  %v613_v17 = vsub.f32 %v565_v54, %v588_v15  ;;  %v612_v18 = vsub.f32 %v564_v55, %v586_v16 }
 0x239   : > { %1125 = vpow2.f32 %v629_v14 }
 0x23a   : > { %v635_v19 = vmul.f32 1.442695, %v613_v17  ;;  %v633_v20 = vmul.f32 1.442695, %v612_v18 }
 0x23c   : > { %1127 = vpow2.f32 %v635_v19 }
 0x23d   : > { %v1118_v21 = vpop.eup %1117  ;;  %1129 = vpow2.f32 %v633_v20 }
 0x23e   : > { %655 = vadd.xlane.f32.xlu1 %v1118_v21 }
 0x241   : > { %v1120_v22 = vpop.eup %1119 }
 0x242   : > { %v1122_v23 = vpop.eup %1121  ;;  %657 = vadd.xlane.f32.xlu0 %v1120_v22 }
 0x243   : > { %659 = vadd.xlane.f32.xlu1 %v1122_v23 }
 0x245   : > { %v1124_v24 = vpop.eup %1123 }
 0x246   : > { %v1126_v25 = vpop.eup %1125 }
 0x247   : > { %663 = vadd.xlane.f32.xlu1 %v1124_v24  ;;  %661 = vadd.xlane.f32.xlu0 %v1126_v25 }
 0x249   : > { %v1128_v26 = vpop.eup %1127 }
 0x24a   : > { %v1130_v27 = vpop.eup %1129 }
 0x24b   : > { %667 = vadd.xlane.f32.xlu1 %v1128_v26  ;;  %665 = vadd.xlane.f32.xlu0 %v1130_v27 }
 0x2c7   : > { %v656_v28 = vpop.xlane.xlu1 %655 }
 0x2c8   : > { %1131 = vrcp.f32 %v656_v28 }
 0x2cb   : > { %v658_v29 = vpop.xlane.xlu0 %657 }
 0x2cc   : > { %1133 = vrcp.f32 %v658_v29  ;;  %v660_v30 = vpop.xlane.xlu1 %659 }
 0x2cd   : > { %1135 = vrcp.f32 %v660_v30 }
 0x2d0   : > { %v662_v31 = vpop.xlane.xlu0 %661  ;;  %v664_v32 = vpop.xlane.xlu1 %663 }
 0x2d1   : > { %1137 = vrcp.f32 %v662_v31 }
 0x2d2   : > { %1139 = vrcp.f32 %v664_v32 }
 0x2d4   : > { %v666_v33 = vpop.xlane.xlu0 %665  ;;  %v668_v34 = vpop.xlane.xlu1 %667 }
 0x2d5   : > { %1141 = vrcp.f32 %v666_v33  ;;  %v1132_v35 = vpop.eup %1131 }
 0x2d6   : > { %1143 = vrcp.f32 %v668_v34  ;;  %v703_v38 = vmul.f32 %v1132_v35, %v1118_v21 }
 0x2d9   : > { %v1134_v36 = vpop.eup %1133 }
 0x2da   : > { %v1136_v37 = vpop.eup %1135  ;;  %v704_v40 = vmul.f32 %v1134_v36, %v1120_v22 }
 0x2db   : > { %v705_v43 = vmul.f32 %v1136_v37, %v1122_v23 }
 0x2dc   : > { %v800_v42 = vadd.f32 %v704_v40, %v703_v38 }
 0x2de   : > { %v1138_v44 = vpop.eup %1137  ;;  %v801_v45 = vadd.f32 %v800_v42, %v705_v43 }
 0x2df   : > { %v1140_v46 = vpop.eup %1139  ;;  %v706_v47 = vmul.f32 %v1138_v44, %v1126_v25 }
 0x2e0   : > { %v707_v50 = vmul.f32 %v1140_v46, %v1124_v24 }
 0x2e1   : > { %v802_v49 = vadd.f32 %v801_v45, %v706_v47 }
 0x2e2   : > { %v1142_v51 = vpop.eup %1141 }
 0x2e3   : > { %v1144_v52 = vpop.eup %1143  ;;  %v803_v53 = vadd.f32 %v802_v49, %v707_v50  ;;  %v708_v54 = vmul.f32 %v1142_v51, %v1130_v27 }
 0x2e4   : > { %v709_v55 = vmul.f32 %v1144_v52, %v1128_v26 }
 0x2e5   : > { %v804_v56 = vadd.f32 %v803_v53, %v708_v54 }
 0x2e6   : > { %v790_v57 = vsel %vm742_vm3, %v709_v55, 0.0 }
 0x2e7   : > { %v805_v58 = vadd.f32 %v804_v56, %v790_v57 }
 0x2e9   : > { %v815_v39 = vrot.slane %v805_v58, 4 }
 0x2eb   : > { %v816_v59 = vadd.f32 %v815_v39, %v805_v58 }
 0x2ed   : > { %v817_v60 = vrot.slane %v816_v59, 2 }
 0x2ef   : > { %v818_v61 = vadd.f32 %v817_v60, %v816_v59 }
 0x2f1   : > { %v819_v62 = vrot.slane %v818_v61, 1 }
 0x2f3   : > { %v820_v63 = vadd.f32 %v819_v62, %v818_v61 }
 0x2f5   : > { %821 = vst [vmem:[%s139_s3] sm:$0x1] %v820_v63 }
 0x2f6 PF: > { %s12_s9 = sadd.s32 1, %s1151_s9  }
 0x2f7   : > { %p9_p4 = scmp.ge.s32.totalorder %s12_s9, 10  }
 0x2f9   :  { %11 = sbr.rel (!%p9_p4) target bundleno = 1 (0x1), region = 58 }

</bundles_post_ra>
